<compile_context>
chip_gen: v7x
topology: tpu7x:2x2x1
jax: 0.10.0
libtpu: 0.0.40
codegen_flags: <defaults>
</compile_context>

<pallas_src>
import functools

import jax
import jax.numpy as jnp
from jax import lax
from jax.experimental import pallas as pl
from jax.experimental.pallas import tpu as pltpu


def _multi_tensorcore() -> bool:
    """True if one Pallas device exposes >1 TensorCore for a 'parallel' grid axis to shard over."""
    try:
        kind = jax.devices()[0].device_kind.lower()
    except Exception:
        return True
    # v2/v3 expose one TC per device; v5e ("v5 lite") and v6e are single-TC chips.
    single_tc_tokens = ("lite", "v5e", "v6e", "v2", "v3")
    return not any(t in kind for t in single_tc_tokens)


def _fused_conv_bn_lrelu_kernel(x_ref, w_ref, b_ref, o_ref, col_ref, *,
                                nb, c, kh, kw, wp, owide, lpad):
    # x_ref:   (NB, C, F)         bf16 zero-padded image(s), row-major flattened (Hp*Wp + zero tail)
    # w_ref:   (OC, KH*KW*C)      bf16 conv weights with BN scale folded in (tap-major K ordering)
    # b_ref:   (OC, 1)            f32 folded conv+BN bias
    # o_ref:   (NB, OC, OH*Wp)    f32 "wide" lane-dense output (valid columns extracted by wrapper)
    # col_ref: (KH*KW*C, NB*Lpad) bf16 im2col staging scratch (fully rewritten every grid step)
    for b in range(nb):
        for i in range(kh):
            for j in range(kw):
                # Stride-1 window of tap (i, j) over the flattened padded image is one contiguous
                # lane slice starting at i*Wp + j; columns whose width index wraps past OW are
                # junk and are simply never copied to the output.
                start = i * wp + j
                r0 = (i * kw + j) * c
                col_ref[r0:r0 + c, b * lpad:(b + 1) * lpad] = \
                    x_ref[b, :, start:start + lpad]
    # Single MXU pass: (OC, KH*KW*C) x (KH*KW*C, NB*Lpad), f32 accumulation.
    y = jnp.dot(w_ref[...], col_ref[...], preferred_element_type=jnp.float32)
    y = y + b_ref[...]                 # folded conv+BN bias, (OC, 1) broadcast over lanes
    y = jnp.maximum(y, 0.1 * y)        # LeakyReLU(0.1): one vmul + one vmax per vreg
    for b in range(nb):
        o_ref[b, :, :] = y[:, b * lpad:b * lpad + owide].astype(o_ref.dtype)


@functools.partial(jax.jit, static_argnames=("stride", "padding"))
def convolutional_layer(x_nchw, conv_w, conv_b, gamma, beta, run_mean, run_var,
                        *, stride, padding):
    """Forward of ConvolutionalLayer: Conv2d -> BatchNorm2d(eval) -> LeakyReLU(0.1)."""
    # TODO(synk): BatchNorm2d is applied in eval mode (running stats); PyTorch's default
    # train-mode batch statistics are not reproduced here.
    # TODO(synk): stride > 1 not implemented in the fused kernel (this module instance uses 1).
    if stride != 1:
        raise NotImplementedError("fused Pallas kernel currently supports stride=1 only")
    eps = 1e-5
    n, cin, h, w = x_nchw.shape
    oc, _, kh, kw = conv_w.shape
    p = padding
    hp, wp = h + 2 * p, w + 2 * p
    oh, ow = hp - kh + 1, wp - kw + 1
    owide = oh * wp                                   # wide output width (junk cols at row ends)
    lpad = -(-owide // 128) * 128                     # per-image lane stride, 128-aligned
    flat_len = (kh - 1) * wp + (kw - 1) + lpad        # every tap slice of width lpad stays in-bounds

    # ---- wrapper glue (tiny XLA ops): halo pad + flatten; fold BN into weights / bias ----
    # TODO(synk): the halo zero-pad stays wrapper-side (one small fused XLA pad) because the
    # contiguous-window im2col needs the padded row-major layout; move it in-kernel (row-halo
    # stores into a zeroed VMEM scratch) if activation sizes grow enough for the extra HBM
    # round trip to matter.
    xb = x_nchw.astype(jnp.bfloat16)                                  # bf16 MXU operand, half DMA
    xpad = jnp.pad(xb, ((0, 0), (0, 0), (p, p), (p, p)))              # (N, C, Hp, Wp)
    x_flat = jnp.pad(xpad.reshape(n, cin, hp * wp),
                     ((0, 0), (0, 0), (0, flat_len - hp * wp)))       # (N, C, F), zero tail

    scale = gamma / jnp.sqrt(run_var + eps)                           # (OC,)
    # (OC, IC, KH, KW) -> (OC, KH, KW, IC) -> (OC, KH*KW*IC): tap-major K, matches col_ref rows.
    w2 = jnp.transpose(conv_w, (0, 2, 3, 1)).reshape(oc, kh * kw * cin)
    w2 = (w2 * scale[:, None]).astype(jnp.bfloat16)                   # BN scale folded, bf16
    bias = ((conv_b - run_mean) * scale + beta).reshape(oc, 1).astype(jnp.float32)

    # Arch-aware grid: collapse the batch into one grid step on single-TC chips (v5e/v6e), keep a
    # batch-parallel grid on multi-TC chips (v4/v5p megacore, v7x) so each core takes one image.
    nb = 1 if (_multi_tensorcore() or n == 1) else n
    grid = (n // nb,)
    dim_sem = ("parallel",) if nb == 1 else ("arbitrary",)

    kernel = functools.partial(_fused_conv_bn_lrelu_kernel, nb=nb, c=cin, kh=kh, kw=kw,
                               wp=wp, owide=owide, lpad=lpad)

    # VMEM note: per grid step this double-buffers ~2 * NB*C*F*2B (input) + ~2 * NB*OC*owide*4B
    # (output) plus the (KH*KW*C, NB*Lpad) scratch -- a few hundred KiB here. At realistic channel
    # counts re-derive the tile against the scoped VMEM budget on v7x FIRST (32 MiB default scoped /
    # 64 MiB physical, i.e. half of v5e/v6e's 128 MiB): add an output-row grid axis or raise
    # vmem_limit_bytes before the whole-image-per-step block blows up there.
    out_wide = pl.pallas_call(
        kernel,
        out_shape=jax.ShapeDtypeStruct((n, oc, owide), jnp.float32),
        grid=grid,
        in_specs=[
            pl.BlockSpec((nb, cin, flat_len), lambda g: (g, 0, 0)),   # flat padded image(s)
            pl.BlockSpec((oc, kh * kw * cin), lambda g: (0, 0)),      # folded weights
            pl.BlockSpec((oc, 1), lambda g: (0, 0)),                  # folded bias
        ],
        out_specs=pl.BlockSpec((nb, oc, owide), lambda g: (g, 0, 0)),
        scratch_shapes=[pltpu.VMEM((kh * kw * cin, nb * lpad), jnp.bfloat16)],
        compiler_params=pltpu.CompilerParams(dimension_semantics=dim_sem),
    )(x_flat, w2, bias)

    # Wide -> NCHW: drop the Wp-OW junk columns at the end of each output row (tiny XLA slice).
    return out_wide.reshape(n, oc, oh, wp)[:, :, :, :ow]


def _reference(x, conv_w, conv_b, gamma, beta, run_mean, run_var, stride, padding):
    eps = 1e-5
    y = lax.conv_general_dilated(
        x, conv_w, window_strides=(stride, stride),
        padding=((padding, padding), (padding, padding)),
        dimension_numbers=("NCHW", "OIHW", "NCHW"))
    y = y + conv_b[None, :, None, None]
    y = (y - run_mean[None, :, None, None]) / jnp.sqrt(run_var[None, :, None, None] + eps)
    y = y * gamma[None, :, None, None] + beta[None, :, None, None]
    return jnp.where(y >= 0, y, 0.1 * y)


if __name__ == "__main__":
    # ConvolutionalLayer(in_channels=4, out_channels=8, kernel_size=3, stride=1, padding=1)
    in_channels, out_channels, kernel_size, stride, padding = 4, 8, 3, 1, 1
    key = jax.random.PRNGKey(0)
    kx, kw_, kb, kg, kbt, km, kv = jax.random.split(key, 7)

    x = jax.random.normal(kx, (2, in_channels, 16, 16), dtype=jnp.float32)
    conv_w = jax.random.normal(
        kw_, (out_channels, in_channels, kernel_size, kernel_size), dtype=jnp.float32) * 0.1
    conv_b = jax.random.normal(kb, (out_channels,), dtype=jnp.float32) * 0.1
    gamma = jax.random.normal(kg, (out_channels,), dtype=jnp.float32) * 0.1 + 1.0
    beta = jax.random.normal(kbt, (out_channels,), dtype=jnp.float32) * 0.1
    run_mean = jax.random.normal(km, (out_channels,), dtype=jnp.float32) * 0.1
    run_var = jnp.abs(jax.random.normal(kv, (out_channels,), dtype=jnp.float32)) * 0.1 + 1.0

    out = convolutional_layer(x, conv_w, conv_b, gamma, beta, run_mean, run_var,
                              stride=stride, padding=padding)
    out = jax.block_until_ready(out)

    ref = _reference(x, conv_w, conv_b, gamma, beta, run_mean, run_var, stride, padding)
    assert out.shape == (2, out_channels, 16, 16), out.shape
    err = float(jnp.max(jnp.abs(out - ref)))
    # bf16 MXU operands with f32 accumulation: tolerance loosened from the f32-only 1e-4.
    assert jnp.allclose(out, ref, atol=2e-2, rtol=2e-2), err
    print("KERNEL_OK")
</pallas_src>

<mosaic_0001>
module attributes {stable_mosaic.version = 11 : i64} {
  func.func @_fused_conv_bn_lrelu_kernel(%arg0: i32, %arg1: memref<1x4x422xbf16, #tpu.memory_space<vmem>>, %arg2: memref<8x36xbf16, #tpu.memory_space<vmem>>, %arg3: memref<8x1xf32, #tpu.memory_space<vmem>>, %arg4: memref<1x8x288xf32, #tpu.memory_space<vmem>>, %arg5: memref<36x384xbf16, #tpu.memory_space<vmem>>) attributes {dimension_semantics = [#tpu.dimension_semantics<parallel>], iteration_bounds = array<i64: 2>, scalar_prefetch = 0 : i64, scratch_operands = 1 : i64, tpu.core_type = #tpu.core_type<tc>, window_params = [{transform_indices = @transform_0, window_bounds = array<i64: 1, 4, 422>}, {pipeline_mode = #tpu.pipeline_mode<synchronous>, transform_indices = @transform_1, window_bounds = array<i64: 8, 36>}, {pipeline_mode = #tpu.pipeline_mode<synchronous>, transform_indices = @transform_2, window_bounds = array<i64: 8, 1>}, {transform_indices = @transform_3, window_bounds = array<i64: 1, 8, 288>}]} {
    %c0 = arith.constant 0 : index
    %c0_0 = arith.constant 0 : index
    %c0_1 = arith.constant 0 : index
    %0 = vector.load %arg1[%c0, %c0_0, %c0_1] : memref<1x4x422xbf16, #tpu.memory_space<vmem>>, vector<1x4x384xbf16>
    %1 = vector.shape_cast %0 : vector<1x4x384xbf16> to vector<4x384xbf16>
    %c0_2 = arith.constant 0 : index
    %c0_3 = arith.constant 0 : index
    %2 = vector.load %arg5[%c0_2, %c0_3] : memref<36x384xbf16, #tpu.memory_space<vmem>>, vector<4x384xbf16>
    tpu.vector_store %arg5[%c0_2, %c0_3], %1 {strides = array<i32>} : memref<36x384xbf16, #tpu.memory_space<vmem>>, vector<4x384xbf16>,
    %c0_4 = arith.constant 0 : index
    %c0_5 = arith.constant 0 : index
    %c1 = arith.constant 1 : index
    %3 = vector.load %arg1[%c0_4, %c0_5, %c1] : memref<1x4x422xbf16, #tpu.memory_space<vmem>>, vector<1x4x384xbf16>
    %4 = vector.shape_cast %3 : vector<1x4x384xbf16> to vector<4x384xbf16>
    %c4 = arith.constant 4 : index
    %c0_6 = arith.constant 0 : index
    %5 = vector.load %arg5[%c4, %c0_6] : memref<36x384xbf16, #tpu.memory_space<vmem>>, vector<4x384xbf16>
    tpu.vector_store %arg5[%c4, %c0_6], %4 {strides = array<i32>} : memref<36x384xbf16, #tpu.memory_space<vmem>>, vector<4x384xbf16>,
    %c0_7 = arith.constant 0 : index
    %c0_8 = arith.constant 0 : index
    %c2 = arith.constant 2 : index
    %6 = vector.load %arg1[%c0_7, %c0_8, %c2] : memref<1x4x422xbf16, #tpu.memory_space<vmem>>, vector<1x4x384xbf16>
    %7 = vector.shape_cast %6 : vector<1x4x384xbf16> to vector<4x384xbf16>
    %c8 = arith.constant 8 : index
    %c0_9 = arith.constant 0 : index
    %8 = vector.load %arg5[%c8, %c0_9] : memref<36x384xbf16, #tpu.memory_space<vmem>>, vector<4x384xbf16>
    tpu.vector_store %arg5[%c8, %c0_9], %7 {strides = array<i32>} : memref<36x384xbf16, #tpu.memory_space<vmem>>, vector<4x384xbf16>,
    %c0_10 = arith.constant 0 : index
    %c0_11 = arith.constant 0 : index
    %c18 = arith.constant 18 : index
    %9 = vector.load %arg1[%c0_10, %c0_11, %c18] : memref<1x4x422xbf16, #tpu.memory_space<vmem>>, vector<1x4x384xbf16>
    %10 = vector.shape_cast %9 : vector<1x4x384xbf16> to vector<4x384xbf16>
    %c12 = arith.constant 12 : index
    %c0_12 = arith.constant 0 : index
    %11 = vector.load %arg5[%c12, %c0_12] : memref<36x384xbf16, #tpu.memory_space<vmem>>, vector<4x384xbf16>
    tpu.vector_store %arg5[%c12, %c0_12], %10 {strides = array<i32>} : memref<36x384xbf16, #tpu.memory_space<vmem>>, vector<4x384xbf16>,
    %c0_13 = arith.constant 0 : index
    %c0_14 = arith.constant 0 : index
    %c19 = arith.constant 19 : index
    %12 = vector.load %arg1[%c0_13, %c0_14, %c19] : memref<1x4x422xbf16, #tpu.memory_space<vmem>>, vector<1x4x384xbf16>
    %13 = vector.shape_cast %12 : vector<1x4x384xbf16> to vector<4x384xbf16>
    %c16 = arith.constant 16 : index
    %c0_15 = arith.constant 0 : index
    %14 = vector.load %arg5[%c16, %c0_15] : memref<36x384xbf16, #tpu.memory_space<vmem>>, vector<4x384xbf16>
    tpu.vector_store %arg5[%c16, %c0_15], %13 {strides = array<i32>} : memref<36x384xbf16, #tpu.memory_space<vmem>>, vector<4x384xbf16>,
    %c0_16 = arith.constant 0 : index
    %c0_17 = arith.constant 0 : index
    %c20 = arith.constant 20 : index
    %15 = vector.load %arg1[%c0_16, %c0_17, %c20] : memref<1x4x422xbf16, #tpu.memory_space<vmem>>, vector<1x4x384xbf16>
    %16 = vector.shape_cast %15 : vector<1x4x384xbf16> to vector<4x384xbf16>
    %c20_18 = arith.constant 20 : index
    %c0_19 = arith.constant 0 : index
    %17 = vector.load %arg5[%c20_18, %c0_19] : memref<36x384xbf16, #tpu.memory_space<vmem>>, vector<4x384xbf16>
    tpu.vector_store %arg5[%c20_18, %c0_19], %16 {strides = array<i32>} : memref<36x384xbf16, #tpu.memory_space<vmem>>, vector<4x384xbf16>,
    %c0_20 = arith.constant 0 : index
    %c0_21 = arith.constant 0 : index
    %c36 = arith.constant 36 : index
    %18 = vector.load %arg1[%c0_20, %c0_21, %c36] : memref<1x4x422xbf16, #tpu.memory_space<vmem>>, vector<1x4x384xbf16>
    %19 = vector.shape_cast %18 : vector<1x4x384xbf16> to vector<4x384xbf16>
    %c24 = arith.constant 24 : index
    %c0_22 = arith.constant 0 : index
    %20 = vector.load %arg5[%c24, %c0_22] : memref<36x384xbf16, #tpu.memory_space<vmem>>, vector<4x384xbf16>
    tpu.vector_store %arg5[%c24, %c0_22], %19 {strides = array<i32>} : memref<36x384xbf16, #tpu.memory_space<vmem>>, vector<4x384xbf16>,
    %c0_23 = arith.constant 0 : index
    %c0_24 = arith.constant 0 : index
    %c37 = arith.constant 37 : index
    %21 = vector.load %arg1[%c0_23, %c0_24, %c37] : memref<1x4x422xbf16, #tpu.memory_space<vmem>>, vector<1x4x384xbf16>
    %22 = vector.shape_cast %21 : vector<1x4x384xbf16> to vector<4x384xbf16>
    %c28 = arith.constant 28 : index
    %c0_25 = arith.constant 0 : index
    %23 = vector.load %arg5[%c28, %c0_25] : memref<36x384xbf16, #tpu.memory_space<vmem>>, vector<4x384xbf16>
    tpu.vector_store %arg5[%c28, %c0_25], %22 {strides = array<i32>} : memref<36x384xbf16, #tpu.memory_space<vmem>>, vector<4x384xbf16>,
    %c0_26 = arith.constant 0 : index
    %c0_27 = arith.constant 0 : index
    %c38 = arith.constant 38 : index
    %24 = vector.load %arg1[%c0_26, %c0_27, %c38] : memref<1x4x422xbf16, #tpu.memory_space<vmem>>, vector<1x4x384xbf16>
    %25 = vector.shape_cast %24 : vector<1x4x384xbf16> to vector<4x384xbf16>
    %c32 = arith.constant 32 : index
    %c0_28 = arith.constant 0 : index
    %26 = vector.load %arg5[%c32, %c0_28] : memref<36x384xbf16, #tpu.memory_space<vmem>>, vector<4x384xbf16>
    tpu.vector_store %arg5[%c32, %c0_28], %25 {strides = array<i32>} : memref<36x384xbf16, #tpu.memory_space<vmem>>, vector<4x384xbf16>,
    %c0_29 = arith.constant 0 : index
    %c0_30 = arith.constant 0 : index
    %27 = vector.load %arg2[%c0_29, %c0_30] : memref<8x36xbf16, #tpu.memory_space<vmem>>, vector<8x36xbf16>
    %c0_31 = arith.constant 0 : index
    %c0_32 = arith.constant 0 : index
    %28 = vector.load %arg5[%c0_31, %c0_32] : memref<36x384xbf16, #tpu.memory_space<vmem>>, vector<36x384xbf16>
    %cst = arith.constant dense<0.000000e+00> : vector<8x384xf32>
    %29 = tpu.matmul %27, %28, %cst {dimension_numbers = #tpu.dot_dimension_numbers<[1], [0], [0], [1], [0, 0, 1, 1], [], []>} : vector<8x36xbf16>, vector<36x384xbf16>, vector<8x384xf32> -> vector<8x384xf32>
    %c0_33 = arith.constant 0 : index
    %c0_34 = arith.constant 0 : index
    %30 = vector.load %arg3[%c0_33, %c0_34] : memref<8x1xf32, #tpu.memory_space<vmem>>, vector<8x1xf32>
    %31 = vector.broadcast %30 : vector<8x1xf32> to vector<8x384xf32>
    %32 = arith.addf %29, %31 : vector<8x384xf32>
    %cst_35 = arith.constant 1.000000e-01 : f32
    %33 = vector.broadcast %cst_35 : f32 to vector<8x384xf32>
    %34 = arith.mulf %33, %32 : vector<8x384xf32>
    %35 = arith.maximumf %32, %34 : vector<8x384xf32>
    %36 = vector.extract_strided_slice %35 {offsets = [0, 0], sizes = [8, 288], strides = [1, 1]} : vector<8x384xf32> to vector<8x288xf32>
    %c0_36 = arith.constant 0 : index
    %c0_37 = arith.constant 0 : index
    %c0_38 = arith.constant 0 : index
    %37 = vector.load %arg4[%c0_36, %c0_37, %c0_38] : memref<1x8x288xf32, #tpu.memory_space<vmem>>, vector<1x8x288xf32>
    %38 = vector.shape_cast %37 : vector<1x8x288xf32> to vector<8x288xf32>
    %39 = vector.shape_cast %36 : vector<8x288xf32> to vector<1x8x288xf32>
    tpu.vector_store %arg4[%c0_36, %c0_37, %c0_38], %39 {strides = array<i32>} : memref<1x8x288xf32, #tpu.memory_space<vmem>>, vector<1x8x288xf32>,
    return
  }
  func.func @transform_0(%arg0: i32) -> (i32, i32, i32) {
    %c0_i32 = arith.constant 0 : i32
    %c0_i32_0 = arith.constant 0 : i32
    %c0_i32_1 = arith.constant 0 : i32
    return %arg0, %c0_i32, %c0_i32_0 : i32, i32, i32
  }
  func.func @transform_1(%arg0: i32) -> (i32, i32) {
    %c0_i32 = arith.constant 0 : i32
    %c0_i32_0 = arith.constant 0 : i32
    %c0_i32_1 = arith.constant 0 : i32
    return %c0_i32, %c0_i32_0 : i32, i32
  }
  func.func @transform_2(%arg0: i32) -> (i32, i32) {
    %c0_i32 = arith.constant 0 : i32
    %c0_i32_0 = arith.constant 0 : i32
    %c0_i32_1 = arith.constant 0 : i32
    return %c0_i32, %c0_i32_0 : i32, i32
  }
  func.func @transform_3(%arg0: i32) -> (i32, i32, i32) {
    %c0_i32 = arith.constant 0 : i32
    %c0_i32_0 = arith.constant 0 : i32
    %c0_i32_1 = arith.constant 0 : i32
    return %arg0, %c0_i32, %c0_i32_0 : i32, i32, i32
  }
}

</mosaic_0001>

<bundles_post_ra>
// kernel: convolutional_layer.1
= control target key start
LH: loop header
LB: loop body
LE: loop exit
PB: predicated region body
PF: predicated region fallthrough
CT: control target
= control target key end

     0   :  { %s774_s12 = smov 0   ;;  %s815_s0 = inlined_call_operand.vmem [shape: bf16[2,4,422], index: 0, kind: input, shape index: {}]   ;;  %s816_s1 = inlined_call_operand.vmem [shape: bf16[8,36], index: 1, kind: input, shape index: {}]   ;;  %s817_s2 = inlined_call_operand.vmem [shape: f32[8,1], index: 2, kind: input, shape index: {}]   ;;  %s818_s3 = inlined_call_operand.vmem [shape: f32[2,8,288], index: 3, kind: output, shape index: {}]  }
   0x1 LB: > { %s659_s13 = sadd.s32 4294967295, %s740_s12   ;;  %p663_p0 = scmp.ge.s32.totalorder %s740_s12, 1  ;;  %s740_s12 = sphi %s774_s12, %s13_s12  }
   0x2   : > { %p137_p1 = scmp.lt.s32.totalorder %s740_s12, 3 }
   0x4   : > { %p138_p2 = pnand %p663_p0, %p137_p1 }
   0x5   : > { %p161_p3 = scmp.lt.s32.totalorder (!%p138_p2), %s659_s13, 1  ;;  %v199_v0 = vlaneseq (!%p138_p2)  ;;  %v742_v1 = vmov (!%p138_p2), 1983009808   ;;  %s743_s18 = smov (!%p138_p2), 126   ;;  %v746_v14 = vmov (!%p138_p2), 0.0   ;;  %vm752_vm0 = vmmov (!%p138_p2), 0  }
   0x6   : > { %141 = sbr.rel (%p138_p2) target bundleno = 400 (0x190), region = 32  ;;  %v197_v2 = vunpack.c.l.s4 (!%p138_p2), %v742_v1  ;;  %s744_s19 = smov (!%p138_p2), 127   ;;  %688 = vmatprep.subr.bf16.mxu1 (!%p138_p2), %v746_v14  ;;  %694 = vmatprep.mubr.msk.bf16.mxu1 (!%p138_p2), %vm752_vm0, %v746_v14  ;;  %v753_v15 = vmov (!%p138_p2), 0   ;;  %v453_v16 = vld [vmem:[%s817_s2] sm:$0xff] (!%p138_p2)  ;;  %vm218_vm1 = vcmask (!%p138_p2), 1039360   ;;  %vm280_vm2 = vcmask (!%p138_p2), 900096  }
   0x7   : > { %v200_v3 = vshrl.u32 (!%p138_p2), %v199_v0, 7  ;;  %s745_s20 = smov (!%p138_p2), 110   ;;  %s747_s21 = smov (!%p138_p2), 109   ;;  %545 = vmatprep.mubr.bf16.mxu0 (!%p138_p2), %v753_v15  ;;  %719 = vset.pattern.permute.xlu0 (!%p138_p2), %v753_v15  ;;  %vm216_vm3 = vcmask (!%p138_p2), 1043456   ;;  %vm249_vm4 = vcmask (!%p138_p2), 1031168   ;;  %vm311_vm5 = vcmask (!%p138_p2), 891904  }
   0x8   : > { %v198_v4 = vunpack.c.0.s8 (!%p138_p2), %v197_v2  ;;  %s748_s22 = smov (!%p138_p2), 108   ;;  %s749_s23 = smov (!%p138_p2), 92   ;;  %vm342_vm6 = vcmask (!%p138_p2), 883712   ;;  %vm373_vm7 = vcmask (!%p138_p2), 752640   ;;  %vm404_vm8 = vcmask (!%p138_p2), 744448  }
   0x9   : > { %s750_s24 = smov (!%p138_p2), 91   ;;  %s751_s25 = smov (!%p138_p2), 90   ;;  %vm435_vm9 = vcmask (!%p138_p2), 736256   ;;  %vm503_vm10 = vcmask (!%p138_p2), 1041408   ;;  %vm499_vm11 = vcmask (!%p138_p2), 293888   ;;  %vm602_vm12 = vcmask (!%p138_p2), 261120  }
   0xa   : > { %v201_v5 = vsub.s32 (!%p138_p2), %v198_v4, %v200_v3 }
   0xd   : > { %s820_s13 = smov (!%p161_p3, %s659_s13), 1 }
   0xe   : > { %s683_s14 = sshll.u32 %s820_s13, 3  ;;  %s698_s30 = smul.u32 24, %s820_s13 }
   0xf   : > { %s165_s17 = scalar_lea.vmem %s815_s0, %s683_s14 }
  0x10   : > { %v225_v6 = vld [vmem:[%s165_s17] sm:$0xff]  ;;  %s170_s6 = scalar_lea.vmem %s818_s3, %s698_s30 }
  0x11   : > { %v172_v7 = vld [vmem:[%s165_s17] sm:$0x3f]  ;;  %v234_v8 = vrot.slane %v225_v6, %v201_v5  ;;  %v195_v9 = vcombine.low %v225_v6, %v225_v6  ;;  %v227_v11 = vcombine.high %v225_v6, %v225_v6 }
  0x12   : > { %v174_v10 = vcombine.high %v172_v7, %v172_v7  ;;  %667 = vst.sshfl [vmem:[#allocation2] sm:$0xf pattern:$0x76325410] %v172_v7 }
  0x13   : > { %242 = vrot.lane.b32.xlu1 %v234_v8, %s743_s18  ;;  %212 = vrot.lane.b32.xlu0 %v234_v8, %s744_s19  ;;  %v202_v12 = vrot.slane %v195_v9, %v201_v5  ;;  %v241_v13 = vrot.slane %v227_v11, %v201_v5 }
  0x14   : > { %668 = vst.sshfl [vmem:[#allocation2 + $0x8] sm:$0x3 pattern:$0x76325410] %v174_v10 }
  0x17   : > { %275 = vrot.lane.b32.xlu1 %v234_v8, %s745_s20  ;;  %210 = vrot.lane.b32.xlu0 %v202_v12, %s744_s19 }
  0x1b   : > { %244 = vrot.lane.b32.xlu1 %v241_v13, %s743_s18  ;;  %273 = vrot.lane.b32.xlu0 %v202_v12, %s745_s20 }
  0x1f   : > { %306 = vrot.lane.b32.xlu1 %v241_v13, %s747_s21  ;;  %304 = vrot.lane.b32.xlu0 %v234_v8, %s747_s21 }
  0x23   : > { %337 = vrot.lane.b32.xlu1 %v234_v8, %s748_s22  ;;  %335 = vrot.lane.b32.xlu0 %v202_v12, %s748_s22 }
  0x27   : > { %368 = vrot.lane.b32.xlu1 %v241_v13, %s749_s23  ;;  %366 = vrot.lane.b32.xlu0 %v234_v8, %s749_s23 }
  0x2b   : > { %399 = vrot.lane.b32.xlu1 %v234_v8, %s750_s24  ;;  %397 = vrot.lane.b32.xlu0 %v202_v12, %s750_s24 }
  0x2f   : > { %430 = vrot.lane.b32.xlu1 %v241_v13, %s751_s25  ;;  %428 = vrot.lane.b32.xlu0 %v234_v8, %s751_s25 }
  0x33   : > { %456 = vperm.xlu0 %719, %v453_v16  }
  0x85   : > { %v243_v17 = vpop.permute.xlu1 %242  ;;  %v213_v18 = vpop.permute.xlu0 %212 }
  0x86   : > { %v215_v19 = vrot.slane %v213_v18, 4  ;;  %v246_v30 = vrot.slane %v243_v17, 4 }
  0x88   : > { %v220_v20 = vsel %vm218_vm1, %v213_v18, %v215_v19 }
  0x89   : > { %224 = vst [vmem:[#allocation2 + $0x8] sm:$0xc] %v220_v20  ;;  %v276_v21 = vpop.permute.xlu1 %275  ;;  %v211_v22 = vpop.permute.xlu0 %210 }
  0x8a   : > { %v278_v23 = vrot.slane %v276_v21, 4  ;;  %v214_v24 = vrot.slane %v211_v22, 4 }
  0x8c   : > { %v282_v25 = vsel %vm280_vm2, %v276_v21, %v278_v23  ;;  %v217_v26 = vsel %vm216_vm3, %v214_v24, %v215_v19  ;;  %v442_v21 = vld [vmem:[%s816_s1] sm:$0xf] }
  0x8d   : > { %286 = vst [vmem:[#allocation2 + $0x14] sm:$0xc] %v282_v25  ;;  %v219_v27 = vsel %vm218_vm1, %v211_v22, %v217_v26  ;;  %v245_v28 = vpop.permute.xlu1 %244  ;;  %v274_v29 = vpop.permute.xlu0 %273 }
  0x8e   : > { %223 = vst [vmem:[#allocation2] sm:$0xcc] %v219_v27  ;;  %v247_v31 = vrot.slane %v245_v28, 4  ;;  %v277_v32 = vrot.slane %v274_v29, 4 }
  0x90   : > { %v248_v33 = vsel %vm216_vm3, %v246_v30, %v247_v31  ;;  %v251_v34 = vsel %vm249_vm4, %v245_v28, %v247_v31  ;;  %v279_v35 = vsel %vm216_vm3, %v277_v32, %v278_v23 }
  0x91   : > { %v250_v36 = vsel %vm249_vm4, %v243_v17, %v248_v33  ;;  %255 = vst [vmem:[#allocation2 + $0x14] sm:$0x3] %v251_v34  ;;  %v281_v37 = vsel %vm280_vm2, %v274_v29, %v279_v35  ;;  %v307_v38 = vpop.permute.xlu1 %306  ;;  %v305_v39 = vpop.permute.xlu0 %304 }
  0x92   : > { %254 = vst [vmem:[#allocation2 + $0xc] sm:$0x33] %v250_v36  ;;  %285 = vst [vmem:[#allocation2 + $0xc] sm:$0xcc] %v281_v37  ;;  %v309_v40 = vrot.slane %v307_v38, 4  ;;  %v308_v41 = vrot.slane %v305_v39, 4 }
  0x94   : > { %v313_v42 = vsel %vm311_vm5, %v307_v38, %v309_v40  ;;  %v310_v43 = vsel %vm216_vm3, %v308_v41, %v309_v40 }
  0x95   : > { %317 = vst [vmem:[#allocation2 + $0x20] sm:$0x3] %v313_v42  ;;  %v312_v44 = vsel %vm311_vm5, %v305_v39, %v310_v43  ;;  %v338_v45 = vpop.permute.xlu1 %337  ;;  %v336_v46 = vpop.permute.xlu0 %335 }
  0x96   : > { %316 = vst [vmem:[#allocation2 + $0x18] sm:$0x33] %v312_v44  ;;  %v340_v47 = vrot.slane %v338_v45, 4  ;;  %v339_v48 = vrot.slane %v336_v46, 4 }
  0x98   : > { %v344_v49 = vsel %vm342_vm6, %v338_v45, %v340_v47  ;;  %v341_v50 = vsel %vm216_vm3, %v339_v48, %v340_v47  ;;  %v723_v51 = vld [vmem:[#allocation2 + $0x8] ss:$12 sps:$4 sm:$0xff]  }
  0x99   : > { %348 = vst [vmem:[#allocation2 + $0x20] sm:$0xc] %v344_v49  ;;  %v343_v52 = vsel %vm342_vm6, %v336_v46, %v341_v50  ;;  %v369_v53 = vpop.permute.xlu1 %368  ;;  %v367_v54 = vpop.permute.xlu0 %366  ;;  %v724_v55 = vld [vmem:[#allocation2 + $0x4] ss:$12 sps:$4 sm:$0xff]   ;;  %v726_v56 = vld [vmem:[#allocation2] ss:$12 sps:$4 sm:$0xff]   ;;  %689 = vmatpush3.bf16.msra.mxu1 %v723_v51 }
  0x9a   : > { %347 = vst [vmem:[#allocation2 + $0x18] sm:$0xcc] %v343_v52  ;;  %v371_v57 = vrot.slane %v369_v53, 4  ;;  %v370_v58 = vrot.slane %v367_v54, 4  ;;  %513 = vmatprep.subr.bf16.mxu0 %v724_v55  ;;  %690 = vmatprep.subr.bf16.mxu1 %v746_v14 }
  0x9b   : > { %514 = vmatpush1.bf16.msra.mxu0 %v726_v56 }
  0x9c   : > { %v375_v59 = vsel %vm373_vm7, %v369_v53, %v371_v57  ;;  %v372_v60 = vsel %vm216_vm3, %v370_v58, %v371_v57 }
  0x9d   : > { %379 = vst [vmem:[#allocation2 + $0x2c] sm:$0x3] %v375_v59  ;;  %v374_v61 = vsel %vm373_vm7, %v367_v54, %v372_v60  ;;  %v400_v62 = vpop.permute.xlu1 %399  ;;  %v398_v63 = vpop.permute.xlu0 %397 }
  0x9e   : > { %378 = vst [vmem:[#allocation2 + $0x24] sm:$0x33] %v374_v61  ;;  %v402_v0 = vrot.slane %v400_v62, 4  ;;  %v401_v1 = vrot.slane %v398_v63, 4 }
  0xa0   : > { %v406_v2 = vsel %vm404_vm8, %v400_v62, %v402_v0  ;;  %v403_v3 = vsel %vm216_vm3, %v401_v1, %v402_v0 }
  0xa1   : > { %410 = vst [vmem:[#allocation2 + $0x2c] sm:$0xc] %v406_v2  ;;  %v405_v4 = vsel %vm404_vm8, %v398_v63, %v403_v3  ;;  %v431_v5 = vpop.permute.xlu1 %430  ;;  %v429_v6 = vpop.permute.xlu0 %428 }
  0xa2   : > { %409 = vst [vmem:[#allocation2 + $0x24] sm:$0xcc] %v405_v4  ;;  %v433_v7 = vrot.slane %v431_v5, 4  ;;  %v432_v8 = vrot.slane %v429_v6, 4 }
  0xa4   : > { %v437_v9 = vsel %vm435_vm9, %v431_v5, %v433_v7  ;;  %v434_v10 = vsel %vm216_vm3, %v432_v8, %v433_v7 }
  0xa5   : > { %441 = vst [vmem:[#allocation2 + $0x38] sm:$0x3] %v437_v9  ;;  %v436_v11 = vsel %vm435_vm9, %v429_v6, %v434_v10 }
  0xa6   : > { %440 = vst [vmem:[#allocation2 + $0x30] sm:$0x33] %v436_v11 }
  0xa8   : > { %v727_v12 = vld [vmem:[#allocation2 + $0x20] ss:$12 sps:$4 sm:$0xff]  }
  0xa9   : > { %v728_v13 = vld [vmem:[#allocation2 + $0x1c] ss:$12 sps:$4 sm:$0xff]   ;;  %v730_v15 = vld [vmem:[#allocation2 + $0x18] ss:$12 sps:$4 sm:$0xff]   ;;  %691 = vmatpush3.bf16.msra.mxu1 %v727_v12 }
  0xaa   : > { %515 = vmatprep.subr.bf16.mxu0 %v728_v13  ;;  %692 = vmatprep.subr.bf16.mxu1 %v746_v14 }
  0xab   : > { %516 = vmatpush1.bf16.msra.mxu0 %v730_v15 }
  0xac   : > { %v732_v16 = vld [vmem:[#allocation2 + $0x38] ss:$0 sps:$4 sm:$0x33]  }
  0xad   : > { %v451_v17 = vld [vmem:[#allocation2 + $0x30] sm:$0x33]  ;;  %v511_v19 = vsel %vm503_vm10, %v732_v16, 0 }
  0xae   : > { %v676_v18 = vcombine.high %v451_v17, %v451_v17  ;;  %v675_v20 = vcombine.low %v451_v17, %v451_v17  ;;  %693 = vmatpush3.bf16.msra.mxu1 %v511_v19 }
  0xb0   : > { %678 = vmatprep.subr.msk.bf16.mxu0 %vm503_vm10, %v676_v18  ;;  %v505_v22 = vsel %vm503_vm10, %v675_v20, 0 }
  0xb1   : > { %518 = vmatpush1.bf16.msra.mxu0 %v505_v22  ;;  %695 = vmatmul.mubr.msk.bf16.vlgmr.msra.gmra.mrb[0].mxu1 %vm499_vm11, %v442_v21 }
  0xb2   : > { %v457_v14 = vpop.permute.xlu0 %456 }
  0xb4   : > { %679 = vmatmul.mubr.msk.bf16.vlgmr.msra.gmra.mrb[0].mxu0 %vm499_vm11, %v442_v21 }
 0x184   : > { %v588_v23 = vpop.f32.mrb[0].mxu1 }
 0x185   : > { %v589_v24 = vadd.f32 %v588_v23, %v457_v14  ;;  %v696_v25 = vpop.f32.mrb[1].mxu1 }
 0x186   : > { %v591_v27 = vpop.f32.mrb[2].mxu1 }
 0x187   : > { %v547_v26 = vpop.f32.mrb[0].mxu0  ;;  %v596_v28 = vmul.f32 0.1, %v589_v24  ;;  %v697_v31 = vpop.f32.mrb[3].mxu1 }
 0x188   : > { %v548_v29 = vadd.f32 %v547_v26, %v457_v14  ;;  %v549_v30 = vpop.f32.mrb[1].mxu0 }
 0x189   : > { %v550_v32 = vadd.f32 %v549_v30, %v457_v14  ;;  %v551_v33 = vpop.f32.mrb[2].mxu0  ;;  %v599_v34 = vmax.f32 %v589_v24, %v596_v28 }
 0x18a   : > { %v594_v35 = vmul.f32 0.1, %v548_v29  ;;  %v552_v36 = vpop.f32.mrb[3].mxu0 }
 0x18b   : > { %v595_v37 = vmul.f32 0.1, %v550_v32  ;;  %603 = vst.msk [vmem:[%s170_s6 + $0x10] sm:$0xff] %vm602_vm12, %v599_v34 }
 0x18c   : > { %v597_v38 = vmax.f32 %v548_v29, %v594_v35 }
 0x18d   : > { %v598_v39 = vmax.f32 %v550_v32, %v595_v37 }
 0x18e   : > { %600 = vst [vmem:[%s170_s6] sm:$0xff] %v597_v38 }
 0x18f   : > { %601 = vst [vmem:[%s170_s6 + $0x8] sm:$0xff] %v598_v39 }
 0x190 PF: > { %s13_s12 = sadd.s32 1, %s740_s12  }
 0x191   : > { %p10_p4 = scmp.ge.s32.totalorder %s13_s12, 4  }
 0x193   :  { %12 = sbr.rel (!%p10_p4) target bundleno = 1 (0x1), region = 62 }

</bundles_post_ra>
